<compile_context>
chip_gen: v6e
topology: v6e:2x2x1
jax: 0.10.0
libtpu: 0.0.40
codegen_flags: <defaults>
</compile_context>

<pallas_src>
import functools

import jax
import jax.numpy as jnp
from jax.experimental import pallas as pl
from jax.experimental.pallas import tpu as pltpu

LN_EPS = 1e-5  # nn.LayerNorm default


def _cdiv(a, b):
    return -(-a // b)


def _round_up(x, m):
    return _cdiv(x, m) * m


def _block_diag(blocks):
    rows = sum(b.shape[0] for b in blocks)
    cols = sum(b.shape[1] for b in blocks)
    out = jnp.zeros((rows, cols), blocks[0].dtype)
    r = c = 0
    for b in blocks:
        out = out.at[r:r + b.shape[0], c:c + b.shape[1]].set(b)
        r += b.shape[0]
        c += b.shape[1]
    return out


def _seg_ln_relu(y, gamma, beta, seg, nseg):
    """Per-`seg`-lane-segment LayerNorm (biased var, eps=1e-5) + affine + ReLU, in f32."""
    parts = []
    for s in range(nseg):
        x = y[:, s * seg:(s + 1) * seg]
        mu = jnp.mean(x, axis=-1, keepdims=True)
        xc = x - mu
        var = jnp.mean(xc * xc, axis=-1, keepdims=True)
        parts.append(xc * jax.lax.rsqrt(var + LN_EPS))
    z = parts[0] if nseg == 1 else jnp.concatenate(parts, axis=-1)
    return jnp.maximum(z * gamma + beta, 0.0)


def layout_reconstructor_kernel(x_ref, w1_ref, w2_ref, w3_ref, v1_ref, v2_ref,
                                o_ref, *, L, P, compute_dtype):
    cdt = compute_dtype
    v1 = v1_ref[...]   # (3, 2*P*L) f32: bias / gamma / beta for stage 1
    v2 = v2_ref[...]   # (4, P*L)   f32: bias / gamma / beta for stage 2, bias for stage 3

    # Stage 1: fused visual+text encoders (block-diagonal weights), P logical
    # rows per packed physical row.  Dropout is identity in eval mode.
    enc = jnp.dot(x_ref[...].astype(cdt), w1_ref[...],
                  preferred_element_type=jnp.float32) + v1[0:1]
    enc = _seg_ln_relu(enc, v1[1:2], v1[2:3], L, 2 * P)

    # Stage 2: fusion Linear(2L, L) + LayerNorm + ReLU (block-diagonal over P).
    h = jnp.dot(enc.astype(cdt), w2_ref[...],
                preferred_element_type=jnp.float32) + v2[0:1]
    h = _seg_ln_relu(h, v2[1:2], v2[2:3], L, P)

    # Stage 3: final Linear(L, L); output stays packed and lane-dense.
    out = jnp.dot(h.astype(cdt), w3_ref[...],
                  preferred_element_type=jnp.float32) + v2[3:4]
    o_ref[...] = out.astype(o_ref.dtype)


def layout_reconstructor(visual, text, params, *, tile_rows=2048, use_bf16=True,
                         out_dtype=jnp.float32):
    """visual: [N, Dv], text: [N, Dt]  ->  [N, L] (out_dtype).  Any N accepted."""
    N, Dv = visual.shape
    Nt, Dt = text.shape
    assert N == Nt, "visual and text must have the same number of rows"
    L = params["wv"].shape[1]
    D = Dv + Dt

    # Pack P logical rows per physical row so every matmul output (and the
    # final HBM store) is 128-lane aligned with no column padding.
    P = 128 // L if (L < 128 and 128 % L == 0) else 1

    cdt = jnp.bfloat16 if use_bf16 else jnp.float32
    w_itemsize = 2 if use_bf16 else 4
    in_itemsize = jnp.dtype(visual.dtype).itemsize
    out_itemsize = jnp.dtype(out_dtype).itemsize

    # ---- weights: encoder fusion + row packing via block-diagonal stacking ----
    w_enc = _block_diag([params["wv"], params["wt"]])                 # (D, 2L)
    wf1 = jnp.concatenate([params["wf1v"], params["wf1t"]], axis=0)   # (2L, L)
    w1 = _block_diag([w_enc] * P).astype(cdt)                         # (P*D,   2*P*L)
    w2 = _block_diag([wf1] * P).astype(cdt)                           # (2*P*L, P*L)
    w3 = _block_diag([params["wf2"]] * P).astype(cdt)                 # (P*L,   P*L)

    # ---- packed per-segment bias / gamma / beta vectors (two small DMAs) ----
    v1 = jnp.concatenate([
        jnp.tile(jnp.concatenate([params["bv"], params["bt"]], -1), (1, P)),
        jnp.tile(jnp.concatenate([params["gv"], params["gt"]], -1), (1, P)),
        jnp.tile(jnp.concatenate([params["bnv"], params["bnt"]], -1), (1, P)),
    ], axis=0).astype(jnp.float32)                                    # (3, 2*P*L)
    v2 = jnp.concatenate([
        jnp.tile(params["bf1"], (1, P)),
        jnp.tile(params["gf"], (1, P)),
        jnp.tile(params["bnf"], (1, P)),
        jnp.tile(params["bf2"], (1, P)),
    ], axis=0).astype(jnp.float32)                                    # (4, P*L)

    # ---- generation-aware VMEM budget (v7x: 64 MiB, v5e/v6e: 128 MiB) ----
    try:
        vmem_cap = int(pltpu.get_tpu_info().vmem_capacity_bytes)
    except Exception:
        vmem_cap = 64 * 2 ** 20                    # conservative (v7x) fallback
    vmem_budget = int(vmem_cap * 0.85)

    weight_bytes = (2 * (w1.size + w2.size + w3.size) * w_itemsize
                    + 2 * (v1.size + v2.size) * 4)

    def vmem_est(t):
        # double-buffered I/O tiles + resident weights + f32/bf16 intermediates
        per_row = (2 * D * in_itemsize + 2 * L * out_itemsize
                   + 2 * L * (4 + w_itemsize) + L * (4 + w_itemsize)
                   + 3 * L * 4)
        return t * per_row + weight_bytes

    # ---- row tiling: big tiles, near-full last tile, >= 2 steps for large N ----
    row_align = 8 * P
    tile_cap = max(row_align, _round_up(int(tile_rows), row_align))
    steps = _cdiv(N, tile_cap)
    if N >= 1024:
        steps = max(steps, 2)       # let the row axis shard across v7x's two TCs
    tile = _round_up(_cdiv(N, steps), row_align)
    while tile > row_align and vmem_est(tile) * 3 // 2 > vmem_budget:
        tile = _round_up(tile // 2, row_align)
    steps = _cdiv(N, tile)
    N_pad = steps * tile
    tile_p = tile // P
    n_packed = N_pad // P
    out_cols = P * L

    # ---- pack the activations: concat + free row-pair reshape ----
    x = jnp.concatenate([visual, text], axis=-1)                      # (N, D)
    if N_pad != N:
        x = jnp.pad(x, ((0, N_pad - N), (0, 0)))
    x = x.reshape(n_packed, P * D)

    # ---- cost estimate ----
    flops = (2 * n_packed * (P * D * 2 * P * L + 2 * P * L * P * L + P * L * P * L)
             + 20 * N_pad * L)
    transcendentals = 3 * N_pad
    bytes_accessed = (n_packed * P * D * in_itemsize
                      + (w1.size + w2.size + w3.size) * w_itemsize
                      + (v1.size + v2.size) * 4
                      + n_packed * out_cols * out_itemsize)

    est = vmem_est(tile)
    vmem_limit = None
    if est > 16 * 2 ** 20:
        vmem_limit = min(max(int(est * 3 // 2), 32 * 2 ** 20), vmem_budget)

    full = lambda a: pl.BlockSpec(a.shape, lambda i: (0,) * a.ndim)

    out = pl.pallas_call(
        functools.partial(layout_reconstructor_kernel, L=L, P=P, compute_dtype=cdt),
        out_shape=jax.ShapeDtypeStruct((n_packed, out_cols), out_dtype),
        grid_spec=pltpu.PrefetchScalarGridSpec(
            num_scalar_prefetch=0,
            grid=(steps,),
            in_specs=[
                pl.BlockSpec((tile_p, P * D), lambda i: (i, 0)),   # activation rows
                full(w1), full(w2), full(w3),                      # resident weights
                full(v1), full(v2),                                # resident vectors
            ],
            out_specs=pl.BlockSpec((tile_p, out_cols), lambda i: (i, 0)),
        ),
        compiler_params=pltpu.CompilerParams(
            dimension_semantics=("parallel",),
            vmem_limit_bytes=vmem_limit,
        ),
        cost_estimate=pl.CostEstimate(
            flops=int(flops),
            transcendentals=int(transcendentals),
            bytes_accessed=int(bytes_accessed),
        ),
    )(x, w1, w2, w3, v1, v2)

    # Free contiguous reshape: (N_pad//P, P*L) -> (N_pad, L), then drop pad rows.
    return out.reshape(N_pad, L)[:N]


def init_params(key, visual_dim, text_dim, layout_dim):
    """Deterministic synthetic parameters.

    Linear weights are stored as (in_features, out_features) so the kernel does
    x @ W (equivalent to PyTorch's x @ W.T with W of shape (out, in)).
    LayerNorm gamma/beta follow the PyTorch default init (ones / zeros).
    """
    ks = jax.random.split(key, 8)
    L = layout_dim
    scale = 0.05
    return {
        "wv": scale * jax.random.normal(ks[0], (visual_dim, L), jnp.float32),
        "bv": scale * jax.random.normal(ks[1], (1, L), jnp.float32),
        "gv": jnp.ones((1, L), jnp.float32),
        "bnv": jnp.zeros((1, L), jnp.float32),
        "wt": scale * jax.random.normal(ks[2], (text_dim, L), jnp.float32),
        "bt": scale * jax.random.normal(ks[3], (1, L), jnp.float32),
        "gt": jnp.ones((1, L), jnp.float32),
        "bnt": jnp.zeros((1, L), jnp.float32),
        # fusion first Linear(2L, L) split into the visual / text halves
        "wf1v": scale * jax.random.normal(ks[4], (L, L), jnp.float32),
        "wf1t": scale * jax.random.normal(ks[5], (L, L), jnp.float32),
        "bf1": scale * jax.random.normal(ks[6], (1, L), jnp.float32),
        "gf": jnp.ones((1, L), jnp.float32),
        "bnf": jnp.zeros((1, L), jnp.float32),
        "wf2": scale * jax.random.normal(ks[7], (L, L), jnp.float32),
        "bf2": jnp.zeros((1, L), jnp.float32),
    }


def _reference(visual, text, p):
    def ln_relu(x, g, b):
        mu = jnp.mean(x, -1, keepdims=True)
        var = jnp.mean((x - mu) ** 2, -1, keepdims=True)
        return jnp.maximum((x - mu) / jnp.sqrt(var + LN_EPS) * g + b, 0.0)

    vl = ln_relu(visual @ p["wv"] + p["bv"], p["gv"], p["bnv"])
    tl = ln_relu(text @ p["wt"] + p["bt"], p["gt"], p["bnt"])
    comb = jnp.concatenate([vl, tl], axis=-1)
    wf1 = jnp.concatenate([p["wf1v"], p["wf1t"]], axis=0)
    h = ln_relu(comb @ wf1 + p["bf1"], p["gf"], p["bnf"])
    return h @ p["wf2"] + p["bf2"]


if __name__ == "__main__":
    visual_dim, text_dim, layout_dim = 32, 48, 64
    key = jax.random.PRNGKey(0)
    k_v, k_t, k_p = jax.random.split(key, 3)
    params = init_params(k_p, visual_dim, text_dim, layout_dim)

    # --- case 1: main path (bf16 MXU operands, f32 LN math), single grid step
    B, S = 2, 8
    visual = jax.random.normal(k_v, (B, S, visual_dim), jnp.float32)
    text = jax.random.normal(k_t, (B, S, text_dim), jnp.float32)
    v2d = visual.reshape(B * S, visual_dim)
    t2d = text.reshape(B * S, text_dim)

    out = layout_reconstructor(v2d, t2d, params, use_bf16=True)
    jax.block_until_ready(out)
    ref = _reference(v2d, t2d, params)
    assert out.shape == (B * S, layout_dim)
    assert jnp.allclose(out, ref, atol=6e-2, rtol=6e-2), "bf16 path mismatch vs reference"
    out3d = out.reshape(B, S, layout_dim)  # caller-side view back to [B, S, L]
    del out3d

    # --- case 2: ragged row count + multi-step grid (pad-to-tile path), f32 exact
    B2, S2 = 4, 13
    v2in = jax.random.normal(jax.random.PRNGKey(1), (B2 * S2, visual_dim), jnp.float32)
    t2in = jax.random.normal(jax.random.PRNGKey(2), (B2 * S2, text_dim), jnp.float32)
    out2 = layout_reconstructor(v2in, t2in, params, tile_rows=16, use_bf16=False)
    jax.block_until_ready(out2)
    ref2 = _reference(v2in, t2in, params)
    assert out2.shape == (B2 * S2, layout_dim)
    assert jnp.allclose(out2, ref2, atol=2e-4, rtol=2e-4), "f32 path mismatch vs reference"

    # TODO(synk): `discriminate()` (Linear->ReLU->Linear->Sigmoid) is not part of
    # forward(); it is omitted from the kernel.
    print("KERNEL_OK")
</pallas_src>

<mosaic_0001>
module attributes {stable_mosaic.version = 11 : i64} {
  func.func @layout_reconstructor_kernel(%arg0: i32, %arg1: memref<8x160xf32, #tpu.memory_space<vmem>>, %arg2: memref<160x256xbf16, #tpu.memory_space<vmem>>, %arg3: memref<256x128xbf16, #tpu.memory_space<vmem>>, %arg4: memref<128x128xbf16, #tpu.memory_space<vmem>>, %arg5: memref<3x256xf32, #tpu.memory_space<vmem>>, %arg6: memref<4x128xf32, #tpu.memory_space<vmem>>, %arg7: memref<8x128xf32, #tpu.memory_space<vmem>>) attributes {dimension_semantics = [#tpu.dimension_semantics<parallel>], iteration_bounds = array<i64: 1>, scalar_prefetch = 0 : i64, scratch_operands = 0 : i64, tpu.core_type = #tpu.core_type<tc>, window_params = [{transform_indices = @transform_0, window_bounds = array<i64: 8, 160>}, {pipeline_mode = #tpu.pipeline_mode<synchronous>, transform_indices = @transform_1, window_bounds = array<i64: 160, 256>}, {pipeline_mode = #tpu.pipeline_mode<synchronous>, transform_indices = @transform_2, window_bounds = array<i64: 256, 128>}, {pipeline_mode = #tpu.pipeline_mode<synchronous>, transform_indices = @transform_3, window_bounds = array<i64: 128, 128>}, {pipeline_mode = #tpu.pipeline_mode<synchronous>, transform_indices = @transform_4, window_bounds = array<i64: 3, 256>}, {pipeline_mode = #tpu.pipeline_mode<synchronous>, transform_indices = @transform_5, window_bounds = array<i64: 4, 128>}, {transform_indices = @transform_6, window_bounds = array<i64: 8, 128>}]} {
    %c0 = arith.constant 0 : index
    %c0_0 = arith.constant 0 : index
    %0 = vector.load %arg5[%c0, %c0_0] : memref<3x256xf32, #tpu.memory_space<vmem>>, vector<3x256xf32>
    %c0_1 = arith.constant 0 : index
    %c0_2 = arith.constant 0 : index
    %1 = vector.load %arg6[%c0_1, %c0_2] : memref<4x128xf32, #tpu.memory_space<vmem>>, vector<4x128xf32>
    %c0_3 = arith.constant 0 : index
    %c0_4 = arith.constant 0 : index
    %2 = vector.load %arg1[%c0_3, %c0_4] : memref<8x160xf32, #tpu.memory_space<vmem>>, vector<8x160xf32>
    %3 = arith.truncf %2 : vector<8x160xf32> to vector<8x160xbf16>
    %c0_5 = arith.constant 0 : index
    %c0_6 = arith.constant 0 : index
    %4 = vector.load %arg2[%c0_5, %c0_6] : memref<160x256xbf16, #tpu.memory_space<vmem>>, vector<160x256xbf16>
    %cst = arith.constant dense<0.000000e+00> : vector<8x256xf32>
    %5 = tpu.matmul %3, %4, %cst {dimension_numbers = #tpu.dot_dimension_numbers<[1], [0], [0], [1], [0, 0, 1, 1], [], []>} : vector<8x160xbf16>, vector<160x256xbf16>, vector<8x256xf32> -> vector<8x256xf32>
    %6 = vector.extract_strided_slice %0 {offsets = [0, 0], sizes = [1, 256], strides = [1, 1]} : vector<3x256xf32> to vector<1x256xf32>
    %7 = vector.broadcast %6 : vector<1x256xf32> to vector<8x256xf32>
    %8 = arith.addf %5, %7 : vector<8x256xf32>
    %9 = vector.extract_strided_slice %0 {offsets = [1, 0], sizes = [1, 256], strides = [1, 1]} : vector<3x256xf32> to vector<1x256xf32>
    %10 = vector.extract_strided_slice %0 {offsets = [2, 0], sizes = [1, 256], strides = [1, 1]} : vector<3x256xf32> to vector<1x256xf32>
    %11 = vector.extract_strided_slice %8 {offsets = [0, 0], sizes = [8, 64], strides = [1, 1]} : vector<8x256xf32> to vector<8x64xf32>
    %cst_7 = arith.constant dense<0.000000e+00> : vector<8xf32>
    %12 = vector.multi_reduction <add>, %11, %cst_7 [1] : vector<8x64xf32> to vector<8xf32>
    %13 = vector.shape_cast %12 : vector<8xf32> to vector<8x1xf32>
    %cst_8 = arith.constant 6.400000e+01 : f32
    %14 = vector.broadcast %cst_8 : f32 to vector<8x1xf32>
    %15 = arith.divf %13, %14 : vector<8x1xf32>
    %16 = vector.broadcast %15 : vector<8x1xf32> to vector<8x64xf32>
    %17 = arith.subf %11, %16 : vector<8x64xf32>
    %18 = arith.mulf %17, %17 : vector<8x64xf32>
    %cst_9 = arith.constant dense<0.000000e+00> : vector<8xf32>
    %19 = vector.multi_reduction <add>, %18, %cst_9 [1] : vector<8x64xf32> to vector<8xf32>
    %20 = vector.shape_cast %19 : vector<8xf32> to vector<8x1xf32>
    %cst_10 = arith.constant 6.400000e+01 : f32
    %21 = vector.broadcast %cst_10 : f32 to vector<8x1xf32>
    %22 = arith.divf %20, %21 : vector<8x1xf32>
    %cst_11 = arith.constant 9.99999974E-6 : f32
    %23 = vector.broadcast %cst_11 : f32 to vector<8x1xf32>
    %24 = arith.addf %22, %23 : vector<8x1xf32>
    %25 = math.rsqrt %24 : vector<8x1xf32>
    %26 = vector.broadcast %25 : vector<8x1xf32> to vector<8x64xf32>
    %27 = arith.mulf %17, %26 : vector<8x64xf32>
    %28 = vector.extract_strided_slice %8 {offsets = [0, 64], sizes = [8, 64], strides = [1, 1]} : vector<8x256xf32> to vector<8x64xf32>
    %cst_12 = arith.constant dense<0.000000e+00> : vector<8xf32>
    %29 = vector.multi_reduction <add>, %28, %cst_12 [1] : vector<8x64xf32> to vector<8xf32>
    %30 = vector.shape_cast %29 : vector<8xf32> to vector<8x1xf32>
    %cst_13 = arith.constant 6.400000e+01 : f32
    %31 = vector.broadcast %cst_13 : f32 to vector<8x1xf32>
    %32 = arith.divf %30, %31 : vector<8x1xf32>
    %33 = vector.broadcast %32 : vector<8x1xf32> to vector<8x64xf32>
    %34 = arith.subf %28, %33 : vector<8x64xf32>
    %35 = arith.mulf %34, %34 : vector<8x64xf32>
    %cst_14 = arith.constant dense<0.000000e+00> : vector<8xf32>
    %36 = vector.multi_reduction <add>, %35, %cst_14 [1] : vector<8x64xf32> to vector<8xf32>
    %37 = vector.shape_cast %36 : vector<8xf32> to vector<8x1xf32>
    %cst_15 = arith.constant 6.400000e+01 : f32
    %38 = vector.broadcast %cst_15 : f32 to vector<8x1xf32>
    %39 = arith.divf %37, %38 : vector<8x1xf32>
    %cst_16 = arith.constant 9.99999974E-6 : f32
    %40 = vector.broadcast %cst_16 : f32 to vector<8x1xf32>
    %41 = arith.addf %39, %40 : vector<8x1xf32>
    %42 = math.rsqrt %41 : vector<8x1xf32>
    %43 = vector.broadcast %42 : vector<8x1xf32> to vector<8x64xf32>
    %44 = arith.mulf %34, %43 : vector<8x64xf32>
    %45 = vector.extract_strided_slice %8 {offsets = [0, 128], sizes = [8, 64], strides = [1, 1]} : vector<8x256xf32> to vector<8x64xf32>
    %cst_17 = arith.constant dense<0.000000e+00> : vector<8xf32>
    %46 = vector.multi_reduction <add>, %45, %cst_17 [1] : vector<8x64xf32> to vector<8xf32>
    %47 = vector.shape_cast %46 : vector<8xf32> to vector<8x1xf32>
    %cst_18 = arith.constant 6.400000e+01 : f32
    %48 = vector.broadcast %cst_18 : f32 to vector<8x1xf32>
    %49 = arith.divf %47, %48 : vector<8x1xf32>
    %50 = vector.broadcast %49 : vector<8x1xf32> to vector<8x64xf32>
    %51 = arith.subf %45, %50 : vector<8x64xf32>
    %52 = arith.mulf %51, %51 : vector<8x64xf32>
    %cst_19 = arith.constant dense<0.000000e+00> : vector<8xf32>
    %53 = vector.multi_reduction <add>, %52, %cst_19 [1] : vector<8x64xf32> to vector<8xf32>
    %54 = vector.shape_cast %53 : vector<8xf32> to vector<8x1xf32>
    %cst_20 = arith.constant 6.400000e+01 : f32
    %55 = vector.broadcast %cst_20 : f32 to vector<8x1xf32>
    %56 = arith.divf %54, %55 : vector<8x1xf32>
    %cst_21 = arith.constant 9.99999974E-6 : f32
    %57 = vector.broadcast %cst_21 : f32 to vector<8x1xf32>
    %58 = arith.addf %56, %57 : vector<8x1xf32>
    %59 = math.rsqrt %58 : vector<8x1xf32>
    %60 = vector.broadcast %59 : vector<8x1xf32> to vector<8x64xf32>
    %61 = arith.mulf %51, %60 : vector<8x64xf32>
    %62 = vector.extract_strided_slice %8 {offsets = [0, 192], sizes = [8, 64], strides = [1, 1]} : vector<8x256xf32> to vector<8x64xf32>
    %cst_22 = arith.constant dense<0.000000e+00> : vector<8xf32>
    %63 = vector.multi_reduction <add>, %62, %cst_22 [1] : vector<8x64xf32> to vector<8xf32>
    %64 = vector.shape_cast %63 : vector<8xf32> to vector<8x1xf32>
    %cst_23 = arith.constant 6.400000e+01 : f32
    %65 = vector.broadcast %cst_23 : f32 to vector<8x1xf32>
    %66 = arith.divf %64, %65 : vector<8x1xf32>
    %67 = vector.broadcast %66 : vector<8x1xf32> to vector<8x64xf32>
    %68 = arith.subf %62, %67 : vector<8x64xf32>
    %69 = arith.mulf %68, %68 : vector<8x64xf32>
    %cst_24 = arith.constant dense<0.000000e+00> : vector<8xf32>
    %70 = vector.multi_reduction <add>, %69, %cst_24 [1] : vector<8x64xf32> to vector<8xf32>
    %71 = vector.shape_cast %70 : vector<8xf32> to vector<8x1xf32>
    %cst_25 = arith.constant 6.400000e+01 : f32
    %72 = vector.broadcast %cst_25 : f32 to vector<8x1xf32>
    %73 = arith.divf %71, %72 : vector<8x1xf32>
    %cst_26 = arith.constant 9.99999974E-6 : f32
    %74 = vector.broadcast %cst_26 : f32 to vector<8x1xf32>
    %75 = arith.addf %73, %74 : vector<8x1xf32>
    %76 = math.rsqrt %75 : vector<8x1xf32>
    %77 = vector.broadcast %76 : vector<8x1xf32> to vector<8x64xf32>
    %78 = arith.mulf %68, %77 : vector<8x64xf32>
    %79 = tpu.concatenate %27, %44, %61, %78 in 1 : vector<8x64xf32>, vector<8x64xf32>, vector<8x64xf32>, vector<8x64xf32> -> vector<8x256xf32>
    %80 = vector.broadcast %9 : vector<1x256xf32> to vector<8x256xf32>
    %81 = arith.mulf %79, %80 : vector<8x256xf32>
    %82 = vector.broadcast %10 : vector<1x256xf32> to vector<8x256xf32>
    %83 = arith.addf %81, %82 : vector<8x256xf32>
    %cst_27 = arith.constant 0.000000e+00 : f32
    %84 = vector.broadcast %cst_27 : f32 to vector<8x256xf32>
    %85 = arith.maximumf %83, %84 : vector<8x256xf32>
    %86 = arith.truncf %85 : vector<8x256xf32> to vector<8x256xbf16>
    %c0_28 = arith.constant 0 : index
    %c0_29 = arith.constant 0 : index
    %87 = vector.load %arg3[%c0_28, %c0_29] : memref<256x128xbf16, #tpu.memory_space<vmem>>, vector<256x128xbf16>
    %cst_30 = arith.constant dense<0.000000e+00> : vector<8x128xf32>
    %88 = tpu.matmul %86, %87, %cst_30 {dimension_numbers = #tpu.dot_dimension_numbers<[1], [0], [0], [1], [0, 0, 1, 1], [], []>} : vector<8x256xbf16>, vector<256x128xbf16>, vector<8x128xf32> -> vector<8x128xf32>
    %89 = vector.extract_strided_slice %1 {offsets = [0, 0], sizes = [1, 128], strides = [1, 1]} : vector<4x128xf32> to vector<1x128xf32>
    %90 = vector.broadcast %89 : vector<1x128xf32> to vector<8x128xf32>
    %91 = arith.addf %88, %90 : vector<8x128xf32>
    %92 = vector.extract_strided_slice %1 {offsets = [1, 0], sizes = [1, 128], strides = [1, 1]} : vector<4x128xf32> to vector<1x128xf32>
    %93 = vector.extract_strided_slice %1 {offsets = [2, 0], sizes = [1, 128], strides = [1, 1]} : vector<4x128xf32> to vector<1x128xf32>
    %94 = vector.extract_strided_slice %91 {offsets = [0, 0], sizes = [8, 64], strides = [1, 1]} : vector<8x128xf32> to vector<8x64xf32>
    %cst_31 = arith.constant dense<0.000000e+00> : vector<8xf32>
    %95 = vector.multi_reduction <add>, %94, %cst_31 [1] : vector<8x64xf32> to vector<8xf32>
    %96 = vector.shape_cast %95 : vector<8xf32> to vector<8x1xf32>
    %cst_32 = arith.constant 6.400000e+01 : f32
    %97 = vector.broadcast %cst_32 : f32 to vector<8x1xf32>
    %98 = arith.divf %96, %97 : vector<8x1xf32>
    %99 = vector.broadcast %98 : vector<8x1xf32> to vector<8x64xf32>
    %100 = arith.subf %94, %99 : vector<8x64xf32>
    %101 = arith.mulf %100, %100 : vector<8x64xf32>
    %cst_33 = arith.constant dense<0.000000e+00> : vector<8xf32>
    %102 = vector.multi_reduction <add>, %101, %cst_33 [1] : vector<8x64xf32> to vector<8xf32>
    %103 = vector.shape_cast %102 : vector<8xf32> to vector<8x1xf32>
    %cst_34 = arith.constant 6.400000e+01 : f32
    %104 = vector.broadcast %cst_34 : f32 to vector<8x1xf32>
    %105 = arith.divf %103, %104 : vector<8x1xf32>
    %cst_35 = arith.constant 9.99999974E-6 : f32
    %106 = vector.broadcast %cst_35 : f32 to vector<8x1xf32>
    %107 = arith.addf %105, %106 : vector<8x1xf32>
    %108 = math.rsqrt %107 : vector<8x1xf32>
    %109 = vector.broadcast %108 : vector<8x1xf32> to vector<8x64xf32>
    %110 = arith.mulf %100, %109 : vector<8x64xf32>
    %111 = vector.extract_strided_slice %91 {offsets = [0, 64], sizes = [8, 64], strides = [1, 1]} : vector<8x128xf32> to vector<8x64xf32>
    %cst_36 = arith.constant dense<0.000000e+00> : vector<8xf32>
    %112 = vector.multi_reduction <add>, %111, %cst_36 [1] : vector<8x64xf32> to vector<8xf32>
    %113 = vector.shape_cast %112 : vector<8xf32> to vector<8x1xf32>
    %cst_37 = arith.constant 6.400000e+01 : f32
    %114 = vector.broadcast %cst_37 : f32 to vector<8x1xf32>
    %115 = arith.divf %113, %114 : vector<8x1xf32>
    %116 = vector.broadcast %115 : vector<8x1xf32> to vector<8x64xf32>
    %117 = arith.subf %111, %116 : vector<8x64xf32>
    %118 = arith.mulf %117, %117 : vector<8x64xf32>
    %cst_38 = arith.constant dense<0.000000e+00> : vector<8xf32>
    %119 = vector.multi_reduction <add>, %118, %cst_38 [1] : vector<8x64xf32> to vector<8xf32>
    %120 = vector.shape_cast %119 : vector<8xf32> to vector<8x1xf32>
    %cst_39 = arith.constant 6.400000e+01 : f32
    %121 = vector.broadcast %cst_39 : f32 to vector<8x1xf32>
    %122 = arith.divf %120, %121 : vector<8x1xf32>
    %cst_40 = arith.constant 9.99999974E-6 : f32
    %123 = vector.broadcast %cst_40 : f32 to vector<8x1xf32>
    %124 = arith.addf %122, %123 : vector<8x1xf32>
    %125 = math.rsqrt %124 : vector<8x1xf32>
    %126 = vector.broadcast %125 : vector<8x1xf32> to vector<8x64xf32>
    %127 = arith.mulf %117, %126 : vector<8x64xf32>
    %128 = tpu.concatenate %110, %127 in 1 : vector<8x64xf32>, vector<8x64xf32> -> vector<8x128xf32>
    %129 = vector.broadcast %92 : vector<1x128xf32> to vector<8x128xf32>
    %130 = arith.mulf %128, %129 : vector<8x128xf32>
    %131 = vector.broadcast %93 : vector<1x128xf32> to vector<8x128xf32>
    %132 = arith.addf %130, %131 : vector<8x128xf32>
    %cst_41 = arith.constant 0.000000e+00 : f32
    %133 = vector.broadcast %cst_41 : f32 to vector<8x128xf32>
    %134 = arith.maximumf %132, %133 : vector<8x128xf32>
    %135 = arith.truncf %134 : vector<8x128xf32> to vector<8x128xbf16>
    %c0_42 = arith.constant 0 : index
    %c0_43 = arith.constant 0 : index
    %136 = vector.load %arg4[%c0_42, %c0_43] : memref<128x128xbf16, #tpu.memory_space<vmem>>, vector<128x128xbf16>
    %cst_44 = arith.constant dense<0.000000e+00> : vector<8x128xf32>
    %137 = tpu.matmul %135, %136, %cst_44 {dimension_numbers = #tpu.dot_dimension_numbers<[1], [0], [0], [1], [0, 0, 1, 1], [], []>} : vector<8x128xbf16>, vector<128x128xbf16>, vector<8x128xf32> -> vector<8x128xf32>
    %138 = vector.extract_strided_slice %1 {offsets = [3, 0], sizes = [1, 128], strides = [1, 1]} : vector<4x128xf32> to vector<1x128xf32>
    %139 = vector.broadcast %138 : vector<1x128xf32> to vector<8x128xf32>
    %140 = arith.addf %137, %139 : vector<8x128xf32>
    %c0_45 = arith.constant 0 : index
    %c0_46 = arith.constant 0 : index
    %141 = vector.load %arg7[%c0_45, %c0_46] : memref<8x128xf32, #tpu.memory_space<vmem>>, vector<8x128xf32>
    tpu.vector_store %arg7[%c0_45, %c0_46], %140 {strides = array<i32>} : memref<8x128xf32, #tpu.memory_space<vmem>>, vector<8x128xf32>,
    return
  }
  func.func @transform_0(%arg0: i32) -> (i32, i32) {
    %c0_i32 = arith.constant 0 : i32
    %c0_i32_0 = arith.constant 0 : i32
    return %arg0, %c0_i32 : i32, i32
  }
  func.func @transform_1(%arg0: i32) -> (i32, i32) {
    %c0_i32 = arith.constant 0 : i32
    %c0_i32_0 = arith.constant 0 : i32
    %c0_i32_1 = arith.constant 0 : i32
    return %c0_i32, %c0_i32_0 : i32, i32
  }
  func.func @transform_2(%arg0: i32) -> (i32, i32) {
    %c0_i32 = arith.constant 0 : i32
    %c0_i32_0 = arith.constant 0 : i32
    %c0_i32_1 = arith.constant 0 : i32
    return %c0_i32, %c0_i32_0 : i32, i32
  }
  func.func @transform_3(%arg0: i32) -> (i32, i32) {
    %c0_i32 = arith.constant 0 : i32
    %c0_i32_0 = arith.constant 0 : i32
    %c0_i32_1 = arith.constant 0 : i32
    return %c0_i32, %c0_i32_0 : i32, i32
  }
  func.func @transform_4(%arg0: i32) -> (i32, i32) {
    %c0_i32 = arith.constant 0 : i32
    %c0_i32_0 = arith.constant 0 : i32
    %c0_i32_1 = arith.constant 0 : i32
    return %c0_i32, %c0_i32_0 : i32, i32
  }
  func.func @transform_5(%arg0: i32) -> (i32, i32) {
    %c0_i32 = arith.constant 0 : i32
    %c0_i32_0 = arith.constant 0 : i32
    %c0_i32_1 = arith.constant 0 : i32
    return %c0_i32, %c0_i32_0 : i32, i32
  }
  func.func @transform_6(%arg0: i32) -> (i32, i32) {
    %c0_i32 = arith.constant 0 : i32
    %c0_i32_0 = arith.constant 0 : i32
    return %arg0, %c0_i32 : i32, i32
  }
}

</mosaic_0001>

<bundles_post_ra>
// kernel: tpu_custom_call.1
= control target key start
LH: loop header
LB: loop body
LE: loop exit
PB: predicated region body
PF: predicated region fallthrough
CT: control target
= control target key end

     0   :  { %11 = vsyncpa [#allocation3], 0  ;;  %s1196_s0 = inlined_call_operand.hbm [shape: f32[8,160], index: 0, kind: input, shape index: {}]   ;;  %s1197_s1 = inlined_call_operand.hbm [shape: bf16[160,256], index: 1, kind: input, shape index: {}]   ;;  %s1198_s2 = inlined_call_operand.hbm [shape: bf16[256,128], index: 2, kind: input, shape index: {}]   ;;  %s1199_s3 = inlined_call_operand.hbm [shape: bf16[128,128], index: 3, kind: input, shape index: {}]   ;;  %s1200_s4 = inlined_call_operand.hbm [shape: f32[3,256], index: 4, kind: input, shape index: {}]   ;;  %s1201_s5 = inlined_call_operand.vmem [shape: f32[4,128], index: 5, kind: input, shape index: {}]   ;;  %s1202_s6 = inlined_call_operand.hbm [shape: f32[8,128], index: 6, kind: output, shape index: {}]  }
   0x1   :  { %12 = vsyncpa [#allocation6], 0 }
   0x2   :  { %13 = vsyncpa [#allocation9], 0 }
   0x3   :  { %14 = vsyncpa [#allocation4], 0  ;;  %s1042_s21 = smov [#allocation5]  }
   0x4   :  { %s30_s22 = sshll.u32 %s1042_s21, 4  ;;  %s31_s22 = int_to_ptr.vmem [resolvable:$true] %s30_s22 }
   0x5   :  { %s922_s23 = scalar_lea.vmem %s31_s22, 2560  ;;  %p927_p1 = scmp.lt.s32.totalorder %s31_s22, %s31_s22 }
   0x6   :  { %p923_p0 = scmp.ne.s32.totalorder %s31_s22, %s922_s23  ;;  %p928_p2 = scmp.lt.s32.totalorder %s922_s23, %s922_s23 }
   0x8   :  { %p929_p3 = por %p928_p2, %p927_p1 }
   0xa   :  { %p930_p4 = pnand %p929_p3, %p923_p0 }
   0xc   :  { %933 = shalt.err (!%p930_p4)
}
   0xd   :  { %s1043_s24 = smov 128   ;;  %s1044_s25 = smov 8  }
   0xe   :  { %36 = dma.hbm_to_vmem [thread:$0]  %s1197_s1, 2560, %s31_s22, [#allocation6], %s1043_s24, %s1043_s24, %s1044_s25  }
   0xf   :  { %s1045_s28 = smov [#allocation8]   ;;  %s1046_s30 = smov [#allocation2]  }
  0x10   :  { %s54_s29 = sshll.u32 %s1045_s28, 4  ;;  %s21_s7 = sshll.u32 %s1046_s30, 4  ;;  %s55_s29 = int_to_ptr.vmem [resolvable:$true] %s54_s29  ;;  %s22_s7 = int_to_ptr.vmem [resolvable:$true] %s21_s7 }
  0x11   :  { %s942_s8 = scalar_lea.vmem %s55_s29, 1024  ;;  %p947_p6 = scmp.lt.s32.totalorder %s55_s29, %s55_s29 }
  0x12   :  { %p943_p5 = scmp.ne.s32.totalorder %s55_s29, %s942_s8  ;;  %p948_p7 = scmp.lt.s32.totalorder %s942_s8, %s942_s8 }
  0x14   :  { %p949_p8 = por %p948_p7, %p947_p6 }
  0x16   :  { %p950_p9 = pnand %p949_p8, %p943_p5 }
  0x18   :  { %953 = shalt.err (!%p950_p9)
}
  0x19   :  { %s1047_s9 = smov 64   ;;  %s1048_s10 = smov 4  }
  0x1a   :  { %60 = dma.hbm_to_vmem [thread:$0]  %s1199_s3, 1024, %s55_s29, [#allocation9], %s1047_s9, %s1047_s9, %s1048_s10  }
  0x1b   :  { %s962_s1 = scalar_lea.vmem %s22_s7, 256  ;;  %p967_p11 = scmp.lt.s32.totalorder %s22_s7, %s22_s7 }
  0x1c   :  { %p963_p10 = scmp.ne.s32.totalorder %s22_s7, %s962_s1  ;;  %p968_p12 = scmp.lt.s32.totalorder %s962_s1, %s962_s1 }
  0x1e   :  { %p969_p13 = por %p968_p12, %p967_p11 }
  0x20   :  { %p970_p0 = pnand %p969_p13, %p963_p10 }
  0x22   :  { %973 = shalt.err (!%p970_p0)
}
  0x23   :  { %24 = dma.hbm_to_vmem [thread:$0]  %s1196_s0, 256, %s22_s7, [#allocation3]  }
  0x24   :  { %s1049_s15 = smov [#allocation7]   ;;  %s1050_s17 = smov [#allocation10]  }
  0x25   :  { %s42_s16 = sshll.u32 %s1049_s15, 4  ;;  %s67_s18 = sshll.u32 %s1050_s17, 4  ;;  %s43_s16 = int_to_ptr.vmem [resolvable:$true] %s42_s16  ;;  %s68_s18 = int_to_ptr.vmem [resolvable:$true] %s67_s18 }
  0x26   :  { %s982_s19 = scalar_lea.vmem %s43_s16, 2048  ;;  %p987_p2 = scmp.lt.s32.totalorder %s43_s16, %s43_s16 }
  0x27   :  { %p983_p1 = scmp.ne.s32.totalorder %s43_s16, %s982_s19  ;;  %p988_p3 = scmp.lt.s32.totalorder %s982_s19, %s982_s19 }
  0x29   :  { %p989_p4 = por %p988_p3, %p987_p2 }
  0x2b   :  { %p990_p5 = pnand %p989_p4, %p983_p1 }
  0x2d   :  { %993 = shalt.err (!%p990_p5)
}
  0x2e   :  { %48 = dma.hbm_to_vmem [thread:$0]  %s1198_s2, 2048, %s43_s16, [#allocation6], %s1047_s9, %s1047_s9, %s1048_s10  }
  0x2f   :  { %s1002_s0 = scalar_lea.vmem %s68_s18, 128  ;;  %p1007_p7 = scmp.lt.s32.totalorder %s68_s18, %s68_s18 }
  0x30   :  { %p1003_p6 = scmp.ne.s32.totalorder %s68_s18, %s1002_s0  ;;  %p1008_p8 = scmp.lt.s32.totalorder %s1002_s0, %s1002_s0 }
  0x32   :  { %p1009_p9 = por %p1008_p8, %p1007_p7 }
  0x34   :  { %p1010_p10 = pnand %p1009_p9, %p1003_p6 }
  0x36   :  { %1013 = shalt.err (!%p1010_p10)
}
  0x37   :  { %70 = dma.hbm_to_vmem [thread:$0]  %s1200_s4, 128, %s68_s18, [#allocation9]  }
  0x38   :  { %1034 = dma.done.wait [#allocation3], 256  }
  0x39   :  { %1035 = vsyncadd [#allocation3], 4294967040 }
  0x3a   :  { %1036 = dma.done.wait [#allocation6], 4608  }
  0x3b   :  { %1037 = vsyncadd [#allocation6], 4294962688 }
  0x3c   :  { %1038 = dma.done.wait [#allocation9], 1152  }
  0x3d   :  { %1039 = vsyncadd [#allocation9], 4294966144  ;;  %v848_v0 = vld [vmem:[#allocation5 + $0x74] ss:$8 sps:$4 sm:$0xff]   ;;  %v850_v1 = vld [vmem:[#allocation5 + $0x70] ss:$8 sps:$4 sm:$0xff]   ;;  %v116_v24 = vlaneseq }
  0x3e   :  { %238 = vmatprep.subr.bf16.mxu0 %v848_v0  ;;  %v851_v2 = vld [vmem:[#allocation5 + $0x64] ss:$8 sps:$4 sm:$0xff]   ;;  %v853_v3 = vld [vmem:[#allocation5 + $0x60] ss:$8 sps:$4 sm:$0xff]   ;;  %v854_v4 = vld [vmem:[#allocation5 + $0x54] ss:$8 sps:$4 sm:$0xff]  }
  0x3f   :  { %239 = vmatpush1.bf16.msra.mxu0 %v850_v1  ;;  %v856_v5 = vld [vmem:[#allocation5 + $0x50] ss:$8 sps:$4 sm:$0xff]   ;;  %v857_v6 = vld [vmem:[#allocation5 + $0x44] ss:$8 sps:$4 sm:$0xff]   ;;  %v859_v7 = vld [vmem:[#allocation5 + $0x40] ss:$8 sps:$4 sm:$0xff]  }
  0x40   :  { %240 = vmatprep.subr.bf16.mxu0 %v851_v2  ;;  %v860_v8 = vld [vmem:[#allocation5 + $0x34] ss:$8 sps:$4 sm:$0xff]   ;;  %v862_v9 = vld [vmem:[#allocation5 + $0x30] ss:$8 sps:$4 sm:$0xff]   ;;  %vm234_vm0 = vcmask 261120   ;;  %v1108_v25 = vshrl.u32 %v116_v24, 7 }
  0x41   :  { %v92_v10 = vld [vmem:[#allocation2 + $0x8] sm:$0xff]  ;;  %v863_v11 = vld [vmem:[#allocation5 + $0x24] ss:$8 sps:$4 sm:$0xff]   ;;  %v865_v13 = vld [vmem:[#allocation5 + $0x20] ss:$8 sps:$4 sm:$0xff]   ;;  %vm279_vm1 = vcmask 523264  }
  0x42   :  { %v94_v12 = vpack.c.bf16 %v92_v10, %v92_v10  ;;  %v866_v14 = vld [vmem:[#allocation5 + $0x14] ss:$8 sps:$4 sm:$0xff]   ;;  %v868_v15 = vld [vmem:[#allocation5 + $0x10] ss:$8 sps:$4 sm:$0xff]   ;;  %v869_v16 = vld [vmem:[#allocation5 + $0x4] ss:$8 sps:$4 sm:$0xff]  }
  0x43   :  { %241 = vmatpush1.bf16.msra.mxu0 %v853_v3  ;;  %v871_v17 = vld [vmem:[#allocation5] ss:$8 sps:$4 sm:$0xff]   ;;  %v872_v18 = vld [vmem:[#allocation5 + $0x94] ss:$8 sps:$4 sm:$0xff]   ;;  %v874_v19 = vld [vmem:[#allocation5 + $0x90] ss:$8 sps:$4 sm:$0xff]  }
  0x44   :  { %242 = vmatprep.subr.bf16.mxu0 %v854_v4  ;;  %760 = vmatprep.mubr.msk.bf16.mxu0 %vm234_vm0, %v94_v12  ;;  %v875_v20 = vld [vmem:[#allocation5 + $0x84] ss:$8 sps:$4 sm:$0xff]   ;;  %v877_v21 = vld [vmem:[#allocation5 + $0x80] ss:$8 sps:$4 sm:$0xff]   ;;  %v91_v22 = vld [vmem:[#allocation2] sm:$0xff]  ;;  %v122_v26 = vsub.s32 4, %v1108_v25 }
  0x45   :  { %v93_v23 = vpack.c.bf16 %v91_v22, %v91_v22  ;;  %v1111_v27 = vld [vmem:[#allocation10] sm:$0x77]  ;;  %v1114_v28 = vsub.s32 0, %v1108_v25  ;;  %v878_v3 = vld [vmem:[#allocation7 + $0x78] sm:$0xff]   ;;  %vm1052_vm2 = vmmov 0  }
  0x46   :  { %v123_v29 = vrot.slane %v1111_v27, %v122_v26  ;;  %v879_v4 = vld [vmem:[#allocation7 + $0x38] sm:$0xff]   ;;  %785 = vmatprep.subr.bf16.mxu1 %v878_v3  ;;  %v885_v10 = vld [vmem:[#allocation7 + $0x20] sm:$0xff]  }
  0x47   :  { %243 = vmatpush1.bf16.msra.mxu0 %v856_v5  ;;  %v119_v30 = vrot.slane %v1111_v27, %v1114_v28  ;;  %786 = vmatpush3.bf16.msra.mxu1 %v879_v4  ;;  %v880_v5 = vld [vmem:[#allocation7 + $0x70] sm:$0xff]   ;;  %v887_v12 = vld [vmem:[#allocation7 + $0x18] sm:$0xff]  }
  0x48   :  { %244 = vmatprep.subr.bf16.mxu0 %v857_v6  ;;  %v133_v31 = vrot.slane %v123_v29, %v1114_v28  ;;  %v881_v6 = vld [vmem:[#allocation7 + $0x30] sm:$0xff]   ;;  %787 = vmatprep.subr.bf16.mxu1 %v880_v5 }
  0x49   :  { %v129_v34 = vrot.slane %v119_v30, %v1114_v28 }
  0x4b   :  { %245 = vmatpush1.bf16.msra.mxu0 %v859_v7  ;;  %788 = vmatpush3.bf16.msra.mxu1 %v881_v6  ;;  %v882_v7 = vld [vmem:[#allocation7 + $0x68] sm:$0xff]  }
  0x4c   :  { %246 = vmatprep.subr.bf16.mxu0 %v860_v8  ;;  %v883_v8 = vld [vmem:[#allocation7 + $0x28] sm:$0xff]   ;;  %789 = vmatprep.subr.bf16.mxu1 %v882_v7 }
  0x4f   :  { %247 = vmatpush1.bf16.msra.mxu0 %v862_v9  ;;  %v884_v9 = vld [vmem:[#allocation7 + $0x60] sm:$0xff]   ;;  %790 = vmatpush3.bf16.msra.mxu1 %v883_v8 }
  0x50   :  { %248 = vmatprep.subr.bf16.mxu0 %v863_v11  ;;  %791 = vmatprep.subr.bf16.mxu1 %v884_v9  ;;  %v886_v11 = vld [vmem:[#allocation7 + $0x58] sm:$0xff]  }
  0x53   :  { %249 = vmatpush1.bf16.msra.mxu0 %v865_v13  ;;  %792 = vmatpush3.bf16.msra.mxu1 %v885_v10  ;;  %v888_v13 = vld [vmem:[#allocation7 + $0x50] sm:$0xff]  }
  0x54   :  { %250 = vmatprep.subr.bf16.mxu0 %v866_v14  ;;  %793 = vmatprep.subr.bf16.mxu1 %v886_v11  ;;  %v889_v14 = vld [vmem:[#allocation7 + $0x10] sm:$0xff]  }
  0x57   :  { %251 = vmatpush1.bf16.msra.mxu0 %v868_v15  ;;  %794 = vmatpush3.bf16.msra.mxu1 %v887_v12  ;;  %v890_v15 = vld [vmem:[#allocation7 + $0x48] sm:$0xff]  }
  0x58   :  { %252 = vmatprep.subr.bf16.mxu0 %v869_v16  ;;  %795 = vmatprep.subr.bf16.mxu1 %v888_v13  ;;  %v891_v16 = vld [vmem:[#allocation7 + $0x8] sm:$0xff]  }
  0x5b   :  { %253 = vmatpush1.bf16.msra.mxu0 %v871_v17  ;;  %796 = vmatpush3.bf16.msra.mxu1 %v889_v14  ;;  %v892_v17 = vld [vmem:[#allocation7 + $0x40] sm:$0xff]  }
  0x5c   :  { %266 = vmatprep.subr.bf16.mxu0 %v872_v18  ;;  %797 = vmatprep.subr.bf16.mxu1 %v890_v15  ;;  %v893_v18 = vld [vmem:[#allocation7] sm:$0xff]  }
  0x5f   :  { %267 = vmatpush2.bf16.msra.mxu0 %v874_v19  ;;  %798 = vmatpush3.bf16.msra.mxu1 %v891_v16 }
  0x60   :  { %268 = vmatprep.subr.bf16.mxu0 %v875_v20  ;;  %799 = vmatprep.subr.bf16.mxu1 %v892_v17 }
  0x63   :  { %269 = vmatpush2.bf16.msra.mxu0 %v877_v21  ;;  %800 = vmatpush3.bf16.msra.mxu1 %v893_v18  ;;  %v894_v18 = vld [vmem:[#allocation8 + $0x38] sm:$0xff]  }
  0x66   :  { %271 = vmatmul.mubr.bf16.vlgmr.msra.gmra.mxu0 %v93_v23 }
 0x126   :  { %v272_v32 = vpop.f32.mrf.mxu0 }
 0x127   :  { %v273_v38 = vadd.f32 %v272_v32, %v129_v34  ;;  %v357_v34 = vsub.s32 5, %v1108_v25 }
 0x128   :  { %v274_v33 = vpop.f32.mrf.mxu0 }
 0x129   :  { %v275_v35 = vadd.f32 %v274_v33, %v133_v31  ;;  %v280_v44 = vsel %vm279_vm1, %v273_v38, 0.0 }
 0x12a   :  { %v276_v36 = vpop.f32.mrf.mxu0 }
 0x12b   :  { %329 = vrot.lane.b32.xlu0 %v275_v35, %s1047_s9  ;;  %v315_v39 = vsel %vm279_vm1, %v275_v35, 0.0  ;;  %v1152_v36 = vsub.s32 1, %v1108_v25 }
 0x12c   :  { %v277_v37 = vpop.f32.mrf.mxu0 }
 0x12d   :  { %v358_v37 = vrot.slane %v1111_v27, %v357_v34 }
 0x12f   :  { %295 = vrot.lane.b32.xlu0 %v273_v38, %s1047_s9 }
 0x14e   :  { %316 = vadd.xlane.f32.xlu0 %v315_v39  ;;  %v1156_v39 = vsub.s32 2, %v1108_v25 }
 0x19d   :  { %v330_v40 = vpop.permute.xlu0 %329 }
 0x19e   :  { %v332_v41 = vsel %vm279_vm1, %v330_v40, 0.0 }
 0x19f   :  { %333 = vadd.xlane.f32.xlu1 %v332_v41 }
 0x1a1   :  { %v296_v42 = vpop.permute.xlu0 %295 }
 0x1a2   :  { %v298_v43 = vsel %vm279_vm1, %v296_v42, 0.0  ;;  %v368_v42 = vrot.slane %v358_v37, %v1152_v36 }
 0x1a3   :  { %299 = vadd.xlane.f32.xlu1 %v298_v43  ;;  %v354_v43 = vrot.slane %v1111_v27, %v1152_v36 }
 0x1a7   :  { %281 = vadd.xlane.f32.xlu1 %v280_v44 }
 0x1d7   :  { %v317_v58 = vpop.xlane.xlu0 %316 }
 0x1d8   :  { %v318_v59 = vmul.f32 0.015625, %v317_v58 }
 0x1da   :  { %v1142_v60 = vsub.f32 %v275_v35, %v318_v59 }
 0x1dc   :  { %v320_v61 = vmul.f32 %v1142_v60, %v1142_v60 }
 0x1de   :  { %v321_v62 = vsel %vm279_vm1, %v320_v61, 0.0 }
 0x228   :  { %v334_v45 = vpop.xlane.xlu1 %333 }
 0x229   :  { %v335_v46 = vmul.f32 0.015625, %v334_v45 }
 0x22b   :  { %v1127_v47 = vsub.f32 %v275_v35, %v335_v46  ;;  %v377_v35 = vsub.s32 6, %v1108_v25 }
 0x22c   :  { %v300_v48 = vpop.xlane.xlu1 %299 }
 0x22d   :  { %v301_v49 = vmul.f32 0.015625, %v300_v48  ;;  %v337_v50 = vmul.f32 %v1127_v47, %v1127_v47  ;;  %v378_v40 = vrot.slane %v1111_v27, %v377_v35 }
 0x22f   :  { %v1131_v51 = vsub.f32 %v273_v38, %v301_v49  ;;  %339 = vrot.lane.b32.xlu1 %v337_v50, %s1047_s9  ;;  %v388_v48 = vrot.slane %v378_v40, %v1156_v39  ;;  %v374_v49 = vrot.slane %v1111_v27, %v1156_v39 }
 0x230   :  { %v282_v52 = vpop.xlane.xlu1 %281 }
 0x231   :  { %v284_v53 = vmul.f32 0.015625, %v282_v52  ;;  %v303_v54 = vmul.f32 %v1131_v51, %v1131_v51  ;;  %v384_v59 = vrot.slane %v374_v49, %v1156_v39 }
 0x233   :  { %v1136_v55 = vsub.f32 %v273_v38, %v284_v53  ;;  %305 = vrot.lane.b32.xlu1 %v303_v54, %s1047_s9  ;;  %v364_v54 = vrot.slane %v354_v43, %v1152_v36 }
 0x235   :  { %v286_v56 = vmul.f32 %v1136_v55, %v1136_v55 }
 0x237   :  { %v287_v57 = vsel %vm279_vm1, %v286_v56, 0.0 }
 0x238   :  { %288 = vadd.xlane.f32.xlu0 %v287_v57 }
 0x257   :  { %322 = vadd.xlane.f32.xlu1 %v321_v62 }
 0x2a1   :  { %v340_v63 = vpop.permute.xlu1 %339 }
 0x2a2   :  { %v342_v0 = vsel %vm279_vm1, %v340_v63, 0.0 }
 0x2a3   :  { %343 = vadd.xlane.f32.xlu0 %v342_v0 }
 0x2a5   :  { %v306_v1 = vpop.permute.xlu1 %305 }
 0x2a6   :  { %v308_v2 = vsel %vm279_vm1, %v306_v1, 0.0  ;;  %v1176_v1 = vld [vmem:[%s1201_s5] sm:$0xf]  ;;  %s1053_s5 = smov [#allocation11]  }
 0x2a7   :  { %309 = vadd.xlane.f32.xlu0 %v308_v2  ;;  %s729_s23 = sshll.u32 %s1053_s5, 4  ;;  %s730_s23 = int_to_ptr.vmem [resolvable:$true] %s729_s23 }
 0x2a8   :  { %s1014_s24 = scalar_lea.vmem %s730_s23, 128  ;;  %p1019_p12 = scmp.lt.s32.totalorder %s730_s23, %s730_s23 }
 0x2a9   :  { %p1015_p11 = scmp.ne.s32.totalorder %s730_s23, %s1014_s24  ;;  %p1020_p13 = scmp.lt.s32.totalorder %s1014_s24, %s1014_s24 }
 0x2ab   :  { %p1021_p0 = por %p1020_p13, %p1019_p12 }
 0x2ad   :  { %p1022_p1 = pnand %p1021_p0, %p1015_p11 }
 0x2c1   :  { %v289_v21 = vpop.xlane.xlu0 %288 }
 0x2c2   :  { %v290_v22 = vmul.f32 0.015625, %v289_v21 }
 0x2c4   :  { %v291_v29 = vadd.f32 1e-05, %v290_v22  ;;  %v895_v22 = vld [vmem:[#allocation8 + $0x30] sm:$0xff]  }
 0x2e0   :  { %v323_v19 = vpop.xlane.xlu1 %322 }
 0x2e1   :  { %v324_v20 = vmul.f32 0.015625, %v323_v19  ;;  %v1051_v19 = vmov 0.0  }
 0x2e2   :  { %816 = vmatprep.subr.bf16.mxu1 %v1051_v19 }
 0x2e3   :  { %v325_v23 = vadd.f32 1e-05, %v324_v20 }
 0x2e5   :  { %902 = vrsqrt.f32 %v325_v23  ;;  %v896_v23 = vld [vmem:[#allocation8 + $0x28] sm:$0xff]  }
 0x2f2   :  { %v903_v38 = vpop.eup %902 }
 0x2f3   :  { %v327_v44 = vmul.f32 %v903_v38, %v1142_v60 }
 0x32c   :  { %v344_v24 = vpop.xlane.xlu0 %343 }
 0x32d   :  { %v345_v26 = vmul.f32 0.015625, %v344_v24  ;;  %v897_v24 = vld [vmem:[#allocation8 + $0x20] sm:$0xff]  }
 0x32f   :  { %v346_v30 = vadd.f32 1e-05, %v345_v26  ;;  %v898_v26 = vld [vmem:[#allocation8 + $0x18] sm:$0xff]  }
 0x330   :  { %v310_v31 = vpop.xlane.xlu0 %309 }
 0x331   :  { %904 = vrsqrt.f32 %v346_v30  ;;  %v311_v32 = vmul.f32 0.015625, %v310_v31  ;;  %v900_v30 = vld [vmem:[#allocation8 + $0x8] sm:$0xff]   ;;  %v901_v31 = vld [vmem:[#allocation8] sm:$0xff]  }
 0x332   :  { %906 = vrsqrt.f32 %v291_v29  ;;  %v899_v29 = vld [vmem:[#allocation8 + $0x10] sm:$0xff]  }
 0x333   :  { %v312_v33 = vadd.f32 1e-05, %v311_v32 }
 0x335   :  { %908 = vrsqrt.f32 %v312_v33 }
 0x33e   :  { %v905_v41 = vpop.eup %904 }
 0x33f   :  { %v348_v45 = vmul.f32 %v905_v41, %v1127_v47  ;;  %v907_v46 = vpop.eup %906 }
 0x340   :  { %v293_v56 = vmul.f32 %v907_v46, %v1136_v55 }
 0x341   :  { %v350_v50 = vsel %vm279_vm1, %v327_v44, %v348_v45  ;;  %v610_v45 = vrot.slane %v1176_v1, %v1156_v39 }
 0x342   :  { %v909_v52 = vpop.eup %908  ;;  %v370_v53 = vmul.f32 %v368_v42, %v350_v50  ;;  %v605_v42 = vrot.slane %v1176_v1, %v1152_v36 }
 0x343   :  { %v314_v57 = vmul.f32 %v909_v52, %v1131_v51  ;;  %v430_v51 = vrot.slane %v1176_v1, %v1114_v28 }
 0x344   :  { %v390_v58 = vadd.f32 %v388_v48, %v370_v53  ;;  %v632_v53 = vsub.s32 3, %v1108_v25 }
 0x345   :  { %v349_v47 = vsel %vm279_vm1, %v293_v56, %v314_v57 }
 0x346   :  { %v392_v60 = vmax.f32 %v390_v58, 0.0  ;;  %v369_v61 = vmul.f32 %v364_v54, %v349_v47  ;;  %v633_v54 = vrot.slane %v1176_v1, %v632_v53 }
 0x348   :  { %v394_v62 = vpack.c.bf16 %v392_v60, %v392_v60  ;;  %v389_v63 = vadd.f32 %v384_v59, %v369_v61 }
 0x34a   :  { %559 = vmatprep.mubr.bf16.mxu1 %v394_v62  ;;  %v391_v27 = vmax.f32 %v389_v63, 0.0 }
 0x34c   :  { %v393_v0 = vpack.c.bf16 %v391_v27, %v391_v27 }
 0x34e   :  { %560 = vmatmul.mubr.bf16.vlgmr.msra.gmra.mxu1 %v393_v0 }
 0x34f   :  { %817 = vmatpush3.bf16.msra.mxu1 %v894_v18  ;;  %832 = vmatprep.mubr.msk.bf16.mxu1 %vm1052_vm2, %v1051_v19 }
 0x350   :  { %818 = vmatprep.subr.bf16.mxu1 %v1051_v19 }
 0x353   :  { %819 = vmatpush3.bf16.msra.mxu1 %v895_v22 }
 0x354   :  { %820 = vmatprep.subr.bf16.mxu1 %v1051_v19 }
 0x357   :  { %821 = vmatpush3.bf16.msra.mxu1 %v896_v23 }
 0x358   :  { %822 = vmatprep.subr.bf16.mxu1 %v1051_v19 }
 0x35b   :  { %823 = vmatpush3.bf16.msra.mxu1 %v897_v24 }
 0x35c   :  { %824 = vmatprep.subr.bf16.mxu1 %v1051_v19 }
 0x35f   :  { %825 = vmatpush3.bf16.msra.mxu1 %v898_v26 }
 0x360   :  { %826 = vmatprep.subr.bf16.mxu1 %v1051_v19 }
 0x363   :  { %827 = vmatpush3.bf16.msra.mxu1 %v899_v29 }
 0x364   :  { %828 = vmatprep.subr.bf16.mxu1 %v1051_v19 }
 0x367   :  { %829 = vmatpush3.bf16.msra.mxu1 %v900_v30 }
 0x368   :  { %830 = vmatprep.subr.bf16.mxu1 %v1051_v19 }
 0x36b   :  { %831 = vmatpush3.bf16.msra.mxu1 %v901_v31 }
 0x40e   :  { %v801_v55 = vpop.f32.mrf.mxu1 }
 0x410   :  { %v802_v2 = vpop.f32.mrf.mxu1 }
 0x411   :  { %v803_v3 = vadd.f32 %v802_v2, %v801_v55 }
 0x412   :  { %v804_v4 = vpop.f32.mrf.mxu1 }
 0x413   :  { %v562_v5 = vadd.f32 %v803_v3, %v430_v51 }
 0x414   :  { %v805_v6 = vpop.f32.mrf.mxu1 }
 0x415   :  { %581 = vrot.lane.b32.xlu0 %v562_v5, %s1047_s9  ;;  %v567_v7 = vsel %vm279_vm1, %v562_v5, 0.0 }
 0x434   :  { %568 = vadd.xlane.f32.xlu0 %v567_v7 }
 0x487   :  { %v582_v8 = vpop.permute.xlu0 %581 }
 0x488   :  { %v584_v9 = vsel %vm279_vm1, %v582_v8, 0.0 }
 0x489   :  { %585 = vadd.xlane.f32.xlu1 %v584_v9 }
 0x4bd   :  { %v569_v28 = vpop.xlane.xlu0 %568 }
 0x4be   :  { %v570_v14 = vmul.f32 0.015625, %v569_v28 }
 0x4c0   :  { %v571_v15 = vsub.f32 %v562_v5, %v570_v14 }
 0x4c2   :  { %v572_v16 = vmul.f32 %v571_v15, %v571_v15 }
 0x4c4   :  { %v573_v17 = vsel %vm279_vm1, %v572_v16, 0.0 }
 0x512   :  { %v586_v10 = vpop.xlane.xlu1 %585 }
 0x513   :  { %v587_v11 = vmul.f32 0.015625, %v586_v10 }
 0x515   :  { %v588_v12 = vsub.f32 %v562_v5, %v587_v11 }
 0x517   :  { %v589_v13 = vmul.f32 %v588_v12, %v588_v12 }
 0x519   :  { %591 = vrot.lane.b32.xlu1 %v589_v13, %s1047_s9 }
 0x53d   :  { %574 = vadd.xlane.f32.xlu1 %v573_v17 }
 0x58b   :  { %v592_v20 = vpop.permute.xlu1 %591 }
 0x58c   :  { %v594_v21 = vsel %vm279_vm1, %v592_v20, 0.0 }
 0x58d   :  { %595 = vadd.xlane.f32.xlu0 %v594_v21 }
 0x5c6   :  { %v575_v32 = vpop.xlane.xlu1 %574 }
 0x5c7   :  { %v576_v33 = vmul.f32 0.015625, %v575_v32 }
 0x5c9   :  { %v577_v34 = vadd.f32 1e-05, %v576_v33 }
 0x5cb   :  { %910 = vrsqrt.f32 %v577_v34 }
 0x5d8   :  { %v911_v40 = vpop.eup %910 }
 0x5d9   :  { %v579_v43 = vmul.f32 %v911_v40, %v571_v15 }
 0x616   :  { %v596_v35 = vpop.xlane.xlu0 %595 }
 0x617   :  { %v597_v37 = vmul.f32 0.015625, %v596_v35 }
 0x619   :  { %v598_v38 = vadd.f32 1e-05, %v597_v37 }
 0x61b   :  { %912 = vrsqrt.f32 %v598_v38 }
 0x628   :  { %v913_v41 = vpop.eup %912 }
 0x629   :  { %v600_v44 = vmul.f32 %v913_v41, %v588_v12 }
 0x62b   :  { %v601_v46 = vsel %vm279_vm1, %v579_v43, %v600_v44 }
 0x62c   :  { %v606_v48 = vmul.f32 %v605_v42, %v601_v46 }
 0x62e   :  { %v611_v49 = vadd.f32 %v610_v45, %v606_v48 }
 0x630   :  { %v612_v50 = vmax.f32 %v611_v49, 0.0 }
 0x632   :  { %v613_v52 = vpack.c.bf16 %v612_v50, %v612_v50 }
 0x634   :  { %833 = vmatmul.mubr.bf16.vlgmr.msra.gmra.mxu1 %v613_v52 }
 0x6f4   :  { %v716_v56 = vpop.f32.mrf.mxu1 }
 0x6f5   :  { %v717_v36 = vadd.f32 %v716_v56, %v633_v54 }
 0x6f6   :  { %v834_v57 = vpop.f32.mrf.mxu1 }
 0x6f7   :  { %722 = vst [vmem:[#allocation11] sm:$0xff] %v717_v36 }
 0x6f8   :  { %v719_v58 = vpop.f32.mrf.mxu1 }
 0x6f9   :  { %1025 = shalt.err (!%p1022_p1)
}
 0x6fa   :  { %732 = dma.vmem_to_hbm [thread:$0]  %s730_s23, 128, %s1202_s6, [#allocation4]   ;;  %v835_v25 = vpop.f32.mrf.mxu1 }
 0x6fb   :  { %1040 = dma.done.wait [#allocation4], 128  }
 0x6fc   :  { %1041 = vsyncadd [#allocation4], 4294967168 }
 0x6fd   :  { %736 = vsyncpa [#allocation3], 1 }
 0x6fe   :  { %737 = vsyncpa [#allocation6], 1 }
 0x6ff   :  { %738 = vsyncpa [#allocation9], 1 }
 0x700   :  { %739 = vsyncpa [#allocation4], 1 }

</bundles_post_ra>
